<compile_context>
chip_gen: v7x
topology: tpu7x:2x2x1
jax: 0.10.0
libtpu: 0.0.40
codegen_flags: <defaults>
</compile_context>

<pallas_src>
import functools
import math

import jax
import jax.numpy as jnp
from jax.experimental import pallas as pl
from jax.experimental.pallas import tpu as pltpu


def _round_up(x, m):
    return ((x + m - 1) // m) * m


def _embedding_kernel(x_ref, w_ref, b_ref, o_ref, acc_ref, *, scale):
    k = pl.program_id(2)

    @pl.when(k == 0)
    def _():
        acc_ref[...] = jnp.zeros_like(acc_ref)

    # MXU matmul in the operands' native dtype (bf16 recommended), f32 accumulate.
    acc_ref[...] += jnp.dot(x_ref[...], w_ref[...],
                            preferred_element_type=jnp.float32)

    @pl.when(k == pl.num_programs(2) - 1)
    def _():
        # Fused epilogue: bias add + sqrt(model_dimension) scale, done once per tile.
        o_ref[...] = ((acc_ref[...] + b_ref[...].astype(jnp.float32)) * scale
                      ).astype(o_ref.dtype)


def embedding(token_ids_batch, w, b, *, tile_rows=256, tile_cols=128, tile_k=512):
    """Forward of the PyTorch Embedding module.

    token_ids_batch: (..., vocab_size) float array (fed straight into the Linear,
                     e.g. one-hot / dense token representations).
    w: (model_dimension, vocab_size)  -- nn.Linear weight layout.
    b: (model_dimension,)
    returns: (..., model_dimension) = (x @ W^T + b) * sqrt(model_dimension)
    """
    *lead, V = token_ids_batch.shape
    D, V_w = w.shape
    assert V == V_w, "vocab_size mismatch between input and weight"
    N = math.prod(lead) if lead else 1

    x2 = token_ids_batch.reshape(N, V)
    wt = w.T                       # (V, D): D on the 128-lane axis for MXU + store
    b2 = b.reshape(1, D)

    # Tile sizes: clamp to the (padded) problem while keeping (8, 128) alignment.
    tm = min(tile_rows, _round_up(N, 8))
    tn = min(tile_cols, _round_up(D, 128))
    tk = min(tile_k, _round_up(V, 128))

    Np, Dp, Vp = _round_up(N, tm), _round_up(D, tn), _round_up(V, tk)
    if (Np, Vp) != (N, V):
        x2 = jnp.pad(x2, ((0, Np - N), (0, Vp - V)))
    if (Vp, Dp) != (V, D):
        wt = jnp.pad(wt, ((0, Vp - V), (0, Dp - D)))
    if Dp != D:
        b2 = jnp.pad(b2, ((0, 0), (0, Dp - D)))

    kernel = functools.partial(_embedding_kernel, scale=float(math.sqrt(D)))

    out = pl.pallas_call(
        kernel,
        out_shape=jax.ShapeDtypeStruct((Np, Dp), token_ids_batch.dtype),
        grid_spec=pltpu.PrefetchScalarGridSpec(
            num_scalar_prefetch=0,
            grid=(Np // tm, Dp // tn, Vp // tk),
            in_specs=[
                pl.BlockSpec((tm, tk), lambda i, j, k: (i, k)),   # x rows
                pl.BlockSpec((tk, tn), lambda i, j, k: (k, j)),   # W^T block
                pl.BlockSpec((1, tn), lambda i, j, k: (0, j)),    # bias
            ],
            out_specs=pl.BlockSpec((tm, tn), lambda i, j, k: (i, j)),
            scratch_shapes=[pltpu.VMEM((tm, tn), jnp.float32)],
        ),
        compiler_params=pltpu.CompilerParams(
            dimension_semantics=("parallel", "parallel", "arbitrary"),
            vmem_limit_bytes=64 * 1024 * 1024,
        ),
    )(x2, wt, b2)

    return out[:N, :D].reshape(*lead, D)


if __name__ == "__main__":
    B, S = 2, 8                 # batch, seq
    VOCAB, D_MODEL = 256, 128   # vocab_size, model_dimension

    key = jax.random.PRNGKey(0)
    kx, kw, kb = jax.random.split(key, 3)

    # The PyTorch module feeds "token_ids_batch" directly into nn.Linear, so the
    # input is a dense (B, S, vocab_size) float tensor (e.g. one-hot rows).
    x = jax.random.normal(kx, (B, S, VOCAB), dtype=jnp.float32)
    bound = 1.0 / math.sqrt(VOCAB)   # nn.Linear default init range
    w = jax.random.uniform(kw, (D_MODEL, VOCAB), minval=-bound, maxval=bound,
                           dtype=jnp.float32)
    b = jax.random.uniform(kb, (D_MODEL,), minval=-bound, maxval=bound,
                           dtype=jnp.float32)

    # --- f32 path: tight correctness check against a pure-JAX reference ---
    out_f32 = embedding(x, w, b)
    jax.block_until_ready(out_f32)
    ref = (x @ w.T + b) * math.sqrt(D_MODEL)
    assert jnp.allclose(out_f32, ref, rtol=1e-4, atol=1e-4), "f32 mismatch vs reference"

    # --- bf16 operands (MXU-native precision tradeoff), looser tolerance ---
    x_bf, w_bf, b_bf = (x.astype(jnp.bfloat16), w.astype(jnp.bfloat16),
                        b.astype(jnp.bfloat16))
    out_bf = embedding(x_bf, w_bf, b_bf)
    jax.block_until_ready(out_bf)
    ref_bf = (x_bf.astype(jnp.float32) @ w_bf.astype(jnp.float32).T
              + b_bf.astype(jnp.float32)) * math.sqrt(D_MODEL)
    assert jnp.allclose(out_bf.astype(jnp.float32), ref_bf, rtol=2e-2, atol=2e-2), \
        "bf16 mismatch vs reference"

    print("KERNEL_OK")
</pallas_src>

<mosaic_0001>
module attributes {stable_mosaic.version = 11 : i64} {
  func.func @_embedding_kernel(%arg0: i32, %arg1: i32, %arg2: i32, %arg3: memref<16x256xf32, #tpu.memory_space<vmem>>, %arg4: memref<256x128xf32, #tpu.memory_space<vmem>>, %arg5: memref<1x128xf32, #tpu.memory_space<vmem>>, %arg6: memref<16x128xf32, #tpu.memory_space<vmem>>, %arg7: memref<16x128xf32, #tpu.memory_space<vmem>>) attributes {dimension_semantics = [#tpu.dimension_semantics<parallel>, #tpu.dimension_semantics<parallel>, #tpu.dimension_semantics<arbitrary>], iteration_bounds = array<i64: 1, 1, 1>, scalar_prefetch = 0 : i64, scratch_operands = 1 : i64, tpu.core_type = #tpu.core_type<tc>, window_params = [{transform_indices = @transform_0, window_bounds = array<i64: 16, 256>}, {transform_indices = @transform_1, window_bounds = array<i64: 256, 128>}, {transform_indices = @transform_2, window_bounds = array<i64: 1, 128>}, {transform_indices = @transform_3, window_bounds = array<i64: 16, 128>}]} {
    %c0_i32 = arith.constant 0 : i32
    %0 = arith.cmpi eq, %arg2, %c0_i32 : i32
    %1 = arith.extui %0 : i1 to i32
    %c0_i32_0 = arith.constant 0 : i32
    %2 = arith.cmpi ne, %1, %c0_i32_0 : i32
    scf.if %2 {
      %cst_10 = arith.constant 0.000000e+00 : f32
      %12 = vector.broadcast %cst_10 : f32 to vector<16x128xf32>
      %c0_11 = arith.constant 0 : index
      %c0_12 = arith.constant 0 : index
      %13 = vector.load %arg7[%c0_11, %c0_12] : memref<16x128xf32, #tpu.memory_space<vmem>>, vector<16x128xf32>
      tpu.vector_store %arg7[%c0_11, %c0_12], %12 {strides = array<i32>} : memref<16x128xf32, #tpu.memory_space<vmem>>, vector<16x128xf32>,
    } else {
    }
    %c0 = arith.constant 0 : index
    %c0_1 = arith.constant 0 : index
    %3 = vector.load %arg7[%c0, %c0_1] : memref<16x128xf32, #tpu.memory_space<vmem>>, vector<16x128xf32>
    %c0_2 = arith.constant 0 : index
    %c0_3 = arith.constant 0 : index
    %4 = vector.load %arg3[%c0_2, %c0_3] : memref<16x256xf32, #tpu.memory_space<vmem>>, vector<16x256xf32>
    %c0_4 = arith.constant 0 : index
    %c0_5 = arith.constant 0 : index
    %5 = vector.load %arg4[%c0_4, %c0_5] : memref<256x128xf32, #tpu.memory_space<vmem>>, vector<256x128xf32>
    %cst = arith.constant dense<0.000000e+00> : vector<16x128xf32>
    %6 = tpu.matmul %4, %5, %cst {dimension_numbers = #tpu.dot_dimension_numbers<[1], [0], [0], [1], [0, 0, 1, 1], [], []>} : vector<16x256xf32>, vector<256x128xf32>, vector<16x128xf32> -> vector<16x128xf32>
    %7 = arith.addf %3, %6 : vector<16x128xf32>
    %c0_6 = arith.constant 0 : index
    %c0_7 = arith.constant 0 : index
    %8 = vector.load %arg7[%c0_6, %c0_7] : memref<16x128xf32, #tpu.memory_space<vmem>>, vector<16x128xf32>
    tpu.vector_store %arg7[%c0_6, %c0_7], %7 {strides = array<i32>} : memref<16x128xf32, #tpu.memory_space<vmem>>, vector<16x128xf32>,
    %c0_i32_8 = arith.constant 0 : i32
    %9 = arith.cmpi eq, %arg2, %c0_i32_8 : i32
    %10 = arith.extui %9 : i1 to i32
    %c0_i32_9 = arith.constant 0 : i32
    %11 = arith.cmpi ne, %10, %c0_i32_9 : i32
    scf.if %11 {
      %c0_10 = arith.constant 0 : index
      %c0_11 = arith.constant 0 : index
      %12 = vector.load %arg7[%c0_10, %c0_11] : memref<16x128xf32, #tpu.memory_space<vmem>>, vector<16x128xf32>
      %c0_12 = arith.constant 0 : index
      %c0_13 = arith.constant 0 : index
      %13 = vector.load %arg5[%c0_12, %c0_13] : memref<1x128xf32, #tpu.memory_space<vmem>>, vector<1x128xf32>
      %14 = vector.broadcast %13 : vector<1x128xf32> to vector<16x128xf32>
      %15 = arith.addf %12, %14 : vector<16x128xf32>
      %cst_14 = arith.constant 11.3137083 : f32
      %16 = vector.broadcast %cst_14 : f32 to vector<16x128xf32>
      %17 = arith.mulf %15, %16 : vector<16x128xf32>
      %c0_15 = arith.constant 0 : index
      %c0_16 = arith.constant 0 : index
      %18 = vector.load %arg6[%c0_15, %c0_16] : memref<16x128xf32, #tpu.memory_space<vmem>>, vector<16x128xf32>
      tpu.vector_store %arg6[%c0_15, %c0_16], %17 {strides = array<i32>} : memref<16x128xf32, #tpu.memory_space<vmem>>, vector<16x128xf32>,
    } else {
    }
    return
  }
  func.func @transform_0(%arg0: i32, %arg1: i32, %arg2: i32) -> (i32, i32) {
    %c0_i32 = arith.constant 0 : i32
    return %arg0, %arg2 : i32, i32
  }
  func.func @transform_1(%arg0: i32, %arg1: i32, %arg2: i32) -> (i32, i32) {
    %c0_i32 = arith.constant 0 : i32
    return %arg2, %arg1 : i32, i32
  }
  func.func @transform_2(%arg0: i32, %arg1: i32, %arg2: i32) -> (i32, i32) {
    %c0_i32 = arith.constant 0 : i32
    %c0_i32_0 = arith.constant 0 : i32
    return %c0_i32, %arg1 : i32, i32
  }
  func.func @transform_3(%arg0: i32, %arg1: i32, %arg2: i32) -> (i32, i32) {
    %c0_i32 = arith.constant 0 : i32
    return %arg0, %arg1 : i32, i32
  }
}

</mosaic_0001>

<bundles_post_ra>
// kernel: tpu_custom_call.1
= control target key start
LH: loop header
LB: loop body
LE: loop exit
PB: predicated region body
PF: predicated region fallthrough
CT: control target
= control target key end

     0   :  { %8 = vsyncpa [#allocation4], 0  ;;  %s484_s0 = inlined_call_operand.hbm [shape: f32[16,256], index: 0, kind: input, shape index: {}]   ;;  %s485_s1 = inlined_call_operand.hbm [shape: f32[256,128], index: 1, kind: input, shape index: {}]   ;;  %s486_s2 = inlined_call_operand.hbm [shape: f32[1,128], index: 2, kind: input, shape index: {}]   ;;  %s487_s3 = inlined_call_operand.hbm [shape: f32[16,128], index: 3, kind: output, shape index: {}]  }
   0x1   :  { %9 = vsyncpa [#allocation7], 0 }
   0x2   :  { %10 = vsyncpa [#allocation5], 0  ;;  %s402_s12 = smov [#allocation6]   ;;  %s308_s16 = scalar_lea.hbm %s485_s1, 4096 }
   0x3   :  { %s28_s13 = sshll.u32 %s402_s12, 4  ;;  %p309_p0 = scmp.ne.s32.totalorder %s485_s1, %s308_s16  ;;  %s29_s13 = int_to_ptr.vmem [resolvable:$true] %s28_s13 }
   0x4   :  { %p312_p1 = scmp.lt.u32.totalorder %s308_s16, %s485_s1 }
   0x6   :  { %p314_p2 = pnand %p312_p1, %p309_p0 }
   0x8   :  { %317 = shalt.err (!%p314_p2)
}
   0x9   :  { %s318_s21 = scalar_lea.vmem %s29_s13, 4096  ;;  %p323_p4 = scmp.lt.s32.totalorder %s29_s13, %s29_s13 }
   0xa   :  { %p319_p3 = scmp.ne.s32.totalorder %s29_s13, %s318_s21  ;;  %p324_p5 = scmp.lt.s32.totalorder %s318_s21, %s318_s21 }
   0xc   :  { %p325_p6 = por %p324_p5, %p323_p4 }
   0xe   :  { %p326_p7 = pnand %p325_p6, %p319_p3 }
  0x10   :  { %329 = shalt.err (!%p326_p7)
}
  0x11   :  { %s403_s22 = smov 128   ;;  %s404_s23 = smov 8  }
  0x12   :  { %34 = dma.hbm_to_vmem [thread:$0]  %s485_s1, 4096, %s29_s13, [#allocation7], %s403_s22, %s403_s22, %s404_s23  }
  0x13   :  { %s405_s26 = smov [#allocation3]   ;;  %s330_s30 = scalar_lea.hbm %s484_s0, 512 }
  0x14   :  { %s16_s27 = sshll.u32 %s405_s26, 4  ;;  %p331_p8 = scmp.ne.s32.totalorder %s484_s0, %s330_s30  ;;  %s17_s27 = int_to_ptr.vmem [resolvable:$true] %s16_s27 }
  0x15   :  { %p334_p9 = scmp.lt.u32.totalorder %s330_s30, %s484_s0 }
  0x17   :  { %p336_p10 = pnand %p334_p9, %p331_p8 }
  0x19   :  { %339 = shalt.err (!%p336_p10)
}
  0x1a   :  { %s340_s8 = scalar_lea.vmem %s17_s27, 512  ;;  %p345_p12 = scmp.lt.s32.totalorder %s17_s27, %s17_s27 }
  0x1b   :  { %p341_p11 = scmp.ne.s32.totalorder %s17_s27, %s340_s8  ;;  %p346_p13 = scmp.lt.s32.totalorder %s340_s8, %s340_s8 }
  0x1d   :  { %p347_p0 = por %p346_p13, %p345_p12 }
  0x1f   :  { %p348_p1 = pnand %p347_p0, %p341_p11 }
  0x21   :  { %351 = shalt.err (!%p348_p1)
}
  0x22   :  { %s406_s1 = smov 256   ;;  %s407_s9 = smov 16  }
  0x23   :  { %22 = dma.hbm_to_vmem [thread:$0]  %s484_s0, 512, %s17_s27, [#allocation4], %s406_s1, %s406_s1, %s407_s9  }
  0x24   :  { %s408_s12 = smov [#allocation8]   ;;  %s352_s16 = scalar_lea.hbm %s486_s2, 16 }
  0x25   :  { %s41_s13 = sshll.u32 %s408_s12, 4  ;;  %p353_p2 = scmp.ne.s32.totalorder %s486_s2, %s352_s16  ;;  %s42_s13 = int_to_ptr.vmem [resolvable:$true] %s41_s13 }
  0x26   :  { %p356_p3 = scmp.lt.u32.totalorder %s352_s16, %s486_s2 }
  0x28   :  { %p358_p4 = pnand %p356_p3, %p353_p2 }
  0x2a   :  { %361 = shalt.err (!%p358_p4)
}
  0x2b   :  { %s362_s21 = scalar_lea.vmem %s42_s13, 16  ;;  %s366_s0 = scalar_lea.vmem %s42_s13, 32 }
  0x2c   :  { %p363_p5 = scmp.ne.s32.totalorder %s42_s13, %s362_s21  ;;  %p367_p6 = scmp.lt.s32.totalorder %s42_s13, %s42_s13 }
  0x2d   :  { %p368_p7 = scmp.lt.s32.totalorder %s366_s0, %s362_s21 }
  0x2f   :  { %p369_p8 = por %p368_p7, %p367_p6 }
  0x31   :  { %p370_p9 = pnand %p369_p8, %p363_p5 }
  0x33   :  { %373 = shalt.err (!%p370_p9)
}
  0x34   :  { %44 = dma.hbm_to_vmem [thread:$0]  %s486_s2, 16, %s42_s13, [#allocation7]  }
  0x35   :  { %396 = dma.done.wait [#allocation4], 512  }
  0x36   :  { %397 = vsyncadd [#allocation4], 4294966784 }
  0x37   :  { %398 = dma.done.wait [#allocation7], 4112  }
  0x38   :  { %399 = vsyncadd [#allocation7], 4294963184  ;;  %v82_v0 = vld [vmem:[#allocation6 + $0x80] sm:$0xff]  ;;  %v83_v1 = vld [vmem:[#allocation6 + $0x88] sm:$0xff]  ;;  %s409_s2 = smov [#allocation9]  }
  0x39   :  { %v66_v2 = vld [vmem:[#allocation6] sm:$0xff]  ;;  %v252_v3 = vpack.c.bf16 %v83_v1, %v82_v0  ;;  %v67_v4 = vld [vmem:[#allocation6 + $0x8] sm:$0xff]  ;;  %v84_v5 = vld [vmem:[#allocation6 + $0x90] sm:$0xff]  ;;  %s200_s26 = sshll.u32 %s409_s2, 4  ;;  %s201_s26 = int_to_ptr.vmem [resolvable:$true] %s200_s26 }
  0x3a   :  { %v85_v6 = vld [vmem:[#allocation6 + $0x98] sm:$0xff]  ;;  %v254_v7 = vpack.c.bf16 %v67_v4, %v66_v2  ;;  %v68_v9 = vld [vmem:[#allocation6 + $0x10] sm:$0xff]  ;;  %v86_v11 = vld [vmem:[#allocation6 + $0xa0] sm:$0xff]  ;;  %s374_s27 = scalar_lea.vmem %s201_s26, 256  ;;  %p379_p11 = scmp.lt.s32.totalorder %s201_s26, %s201_s26 }
  0x3b   :  { %v256_v8 = vpack.c.bf16 %v85_v6, %v84_v5  ;;  %v69_v10 = vld [vmem:[#allocation6 + $0x18] sm:$0xff]  ;;  %253 = vmatprep.subr.bf16.mxu0 %v252_v3  ;;  %284 = vmatprep.subr.bf16.mxu1 %v252_v3  ;;  %v87_v12 = vld [vmem:[#allocation6 + $0xa8] sm:$0xff]  ;;  %v70_v15 = vld [vmem:[#allocation6 + $0x20] sm:$0xff]  ;;  %p375_p10 = scmp.ne.s32.totalorder %s201_s26, %s374_s27  ;;  %p380_p12 = scmp.lt.s32.totalorder %s374_s27, %s374_s27 }
  0x3c   :  { %255 = vmatpush3.bf16.msra.mxu0 %v254_v7  ;;  %292 = vmatpush3.bf16.msra.mxu1 %v254_v7  ;;  %v258_v13 = vpack.c.bf16 %v69_v10, %v68_v9  ;;  %v260_v14 = vpack.c.bf16 %v87_v12, %v86_v11  ;;  %v71_v16 = vld [vmem:[#allocation6 + $0x28] sm:$0xff]  ;;  %v88_v17 = vld [vmem:[#allocation6 + $0xb0] sm:$0xff]  ;;  %v89_v18 = vld [vmem:[#allocation6 + $0xb8] sm:$0xff] }
  0x3d   :  { %257 = vmatprep.subr.bf16.mxu0 %v256_v8  ;;  %285 = vmatprep.subr.bf16.mxu1 %v256_v8  ;;  %v262_v19 = vpack.c.bf16 %v71_v16, %v70_v15  ;;  %v264_v20 = vpack.c.bf16 %v89_v18, %v88_v17  ;;  %v72_v21 = vld [vmem:[#allocation6 + $0x30] sm:$0xff]  ;;  %v73_v22 = vld [vmem:[#allocation6 + $0x38] sm:$0xff]  ;;  %v90_v23 = vld [vmem:[#allocation6 + $0xc0] sm:$0xff]  ;;  %p381_p13 = por %p380_p12, %p379_p11 }
  0x3e   :  { %v91_v24 = vld [vmem:[#allocation6 + $0xc8] sm:$0xff]  ;;  %v65_v26 = vld [vmem:[#allocation3 + $0x18] sm:$0xff]  ;;  %v266_v27 = vpack.c.bf16 %v73_v22, %v72_v21  ;;  %v74_v29 = vld [vmem:[#allocation6 + $0x40] sm:$0xff] }
  0x3f   :  { %v63_v25 = vld [vmem:[#allocation3 + $0x8] sm:$0xff]  ;;  %v268_v28 = vpack.c.bf16 %v91_v24, %v90_v23  ;;  %v92_v31 = vld [vmem:[#allocation6 + $0xd0] sm:$0xff]  ;;  %v93_v32 = vld [vmem:[#allocation6 + $0xd8] sm:$0xff]  ;;  %167 = vmatprep.mubr.f32.mxu1 %v65_v26  ;;  %p382_p0 = pnand %p381_p13, %p375_p10 }
  0x40   :  { %259 = vmatpush3.bf16.msra.mxu0 %v258_v13  ;;  %293 = vmatpush3.bf16.msra.mxu1 %v258_v13  ;;  %v75_v30 = vld [vmem:[#allocation6 + $0x48] sm:$0xff]  ;;  %v272_v34 = vpack.c.bf16 %v93_v32, %v92_v31  ;;  %v76_v35 = vld [vmem:[#allocation6 + $0x50] sm:$0xff]  ;;  %v77_v36 = vld [vmem:[#allocation6 + $0x58] sm:$0xff] }
  0x41   :  { %261 = vmatprep.subr.bf16.mxu0 %v260_v14  ;;  %286 = vmatprep.subr.bf16.mxu1 %v260_v14  ;;  %v270_v33 = vpack.c.bf16 %v75_v30, %v74_v29  ;;  %v94_v37 = vld [vmem:[#allocation6 + $0xe0] sm:$0xff]  ;;  %v95_v38 = vld [vmem:[#allocation6 + $0xe8] sm:$0xff]  ;;  %v274_v39 = vpack.c.bf16 %v77_v36, %v76_v35  ;;  %v96_v43 = vld [vmem:[#allocation6 + $0xf0] sm:$0xff] }
  0x42   :  { %162 = vmatprep.mubr.f32.mxu0 %v63_v25  ;;  %v276_v40 = vpack.c.bf16 %v95_v38, %v94_v37  ;;  %v78_v41 = vld [vmem:[#allocation6 + $0x60] sm:$0xff]  ;;  %v79_v42 = vld [vmem:[#allocation6 + $0x68] sm:$0xff]  ;;  %v97_v44 = vld [vmem:[#allocation6 + $0xf8] sm:$0xff] }
  0x43   :  { %v278_v45 = vpack.c.bf16 %v79_v42, %v78_v41  ;;  %v280_v46 = vpack.c.bf16 %v97_v44, %v96_v43  ;;  %v80_v47 = vld [vmem:[#allocation6 + $0x70] sm:$0xff]  ;;  %v81_v48 = vld [vmem:[#allocation6 + $0x78] sm:$0xff]  ;;  %v62_v50 = vld [vmem:[#allocation3] sm:$0xff] }
  0x44   :  { %263 = vmatpush3.bf16.msra.mxu0 %v262_v19  ;;  %294 = vmatpush3.bf16.msra.mxu1 %v262_v19  ;;  %v282_v49 = vpack.c.bf16 %v81_v48, %v80_v47  ;;  %v64_v51 = vld [vmem:[#allocation3 + $0x10] sm:$0xff]  ;;  %v213_v55 = vld [vmem:[#allocation8] ss:$0 sm:$0xff] }
  0x45   :  { %265 = vmatprep.subr.bf16.mxu0 %v264_v20  ;;  %287 = vmatprep.subr.bf16.mxu1 %v264_v20 }
  0x48   :  { %267 = vmatpush3.bf16.msra.mxu0 %v266_v27  ;;  %295 = vmatpush3.bf16.msra.mxu1 %v266_v27 }
  0x49   :  { %269 = vmatprep.subr.bf16.mxu0 %v268_v28  ;;  %288 = vmatprep.subr.bf16.mxu1 %v268_v28 }
  0x4c   :  { %271 = vmatpush3.bf16.msra.mxu0 %v270_v33  ;;  %296 = vmatpush3.bf16.msra.mxu1 %v270_v33 }
  0x4d   :  { %273 = vmatprep.subr.bf16.mxu0 %v272_v34  ;;  %289 = vmatprep.subr.bf16.mxu1 %v272_v34 }
  0x50   :  { %275 = vmatpush3.bf16.msra.mxu0 %v274_v39  ;;  %297 = vmatpush3.bf16.msra.mxu1 %v274_v39 }
  0x51   :  { %277 = vmatprep.subr.bf16.mxu0 %v276_v40  ;;  %290 = vmatprep.subr.bf16.mxu1 %v276_v40 }
  0x54   :  { %279 = vmatpush3.bf16.msra.mxu0 %v278_v45  ;;  %298 = vmatpush3.bf16.msra.mxu1 %v278_v45 }
  0x55   :  { %281 = vmatprep.subr.bf16.mxu0 %v280_v46  ;;  %291 = vmatprep.subr.bf16.mxu1 %v280_v46 }
  0x58   :  { %283 = vmatpush3.bf16.msra.mxu0 %v282_v49  ;;  %299 = vmatpush3.bf16.msra.mxu1 %v282_v49 }
  0x5b   :  { %163 = vmatmul.mubr.f32.vlgmr.msra.gmra.mrb[0].mxu0 %v62_v50  ;;  %168 = vmatmul.mubr.f32.vlgmr.msra.gmra.mrb[0].mxu1 %v64_v51 }
 0x12e   :  { %v246_v52 = vpop.f32.mrb[0].mxu0  ;;  %v249_v53 = vpop.f32.mrb[0].mxu1 }
 0x12f   :  { %v247_v54 = vpop.f32.mrb[1].mxu0  ;;  %v250_v56 = vpop.f32.mrb[1].mxu1 }
 0x130   :  { %v248_v57 = vadd.f32 %v247_v54, %v246_v52  ;;  %v251_v58 = vadd.f32 %v250_v56, %v249_v53 }
 0x132   :  { %v189_v59 = vadd.f32 %v248_v57, %v213_v55  ;;  %v190_v60 = vadd.f32 %v251_v58, %v213_v55 }
 0x134   :  { %v191_v61 = vmul.f32 11.313708, %v189_v59  ;;  %v192_v62 = vmul.f32 11.313708, %v190_v60 }
 0x136   :  { %193 = vst [vmem:[#allocation9] sm:$0xff] %v191_v61  ;;  %194 = vst [vmem:[#allocation9 + $0x8] sm:$0xff] %v192_v62 }
 0x137   :  { %385 = shalt.err (!%p382_p0)
}
 0x138   :  { %s386_s30 = scalar_lea.hbm %s487_s3, 256 }
 0x139   :  { %p387_p1 = scmp.ne.s32.totalorder %s487_s3, %s386_s30  ;;  %p390_p2 = scmp.lt.u32.totalorder %s386_s30, %s487_s3 }
 0x13b   :  { %p392_p3 = pnand %p390_p2, %p387_p1 }
 0x13d   :  { %395 = shalt.err (!%p392_p3)
}
 0x13e   :  { %206 = dma.vmem_to_hbm [thread:$0]  %s201_s26, 256, %s487_s3, [#allocation5], %s403_s22, %s403_s22, %s404_s23  }
 0x13f   :  { %400 = dma.done.wait [#allocation5], 256  }
 0x140   :  { %401 = vsyncadd [#allocation5], 4294967040 }
 0x141   :  { %210 = vsyncpa [#allocation4], 1 }
 0x142   :  { %211 = vsyncpa [#allocation7], 1 }
 0x143   :  { %212 = vsyncpa [#allocation5], 1 }

</bundles_post_ra>
